<compile_context>
chip_gen: v7x
topology: tpu7x:2x2x1
jax: 0.10.0
libtpu: 0.0.40
codegen_flags: <defaults>
</compile_context>

<pallas_src>
import functools

import numpy as np
import jax
import jax.numpy as jnp
from jax.experimental import pallas as pl
from jax.experimental.pallas import tpu as pltpu

EPS = 1e-06


def _round_up(x, m):
    return ((x + m - 1) // m) * m


# ----------------------------------------------------------------------------
# Host-side constant construction (exact ports of the numpy code in the module)
# ----------------------------------------------------------------------------
def build_C(F):
    ctrl_pts_x = np.linspace(-1.0, 1.0, int(F / 2))
    ctrl_pts_y_top = -1 * np.ones(int(F / 2))
    ctrl_pts_y_bottom = np.ones(int(F / 2))
    ctrl_pts_top = np.stack([ctrl_pts_x, ctrl_pts_y_top], axis=1)
    ctrl_pts_bottom = np.stack([ctrl_pts_x, ctrl_pts_y_bottom], axis=1)
    return np.concatenate([ctrl_pts_top, ctrl_pts_bottom], axis=0)


def build_P(I_r_size):
    I_r_height, I_r_width = I_r_size
    I_r_grid_x = (np.arange(-I_r_width, I_r_width, 2) + 1.0) / I_r_width
    I_r_grid_y = (np.arange(-I_r_height, I_r_height, 2) + 1.0) / I_r_height
    P = np.stack(np.meshgrid(I_r_grid_x, I_r_grid_y), axis=2)
    return P.reshape([-1, 2])


def build_inv_delta_C(F, C):
    hat_C = np.zeros((F, F), dtype=float)
    for i in range(0, F):
        for j in range(i, F):
            r = np.linalg.norm(C[i] - C[j])
            hat_C[i, j] = r
            hat_C[j, i] = r
    np.fill_diagonal(hat_C, 1)
    hat_C = hat_C ** 2 * np.log(hat_C)
    delta_C = np.concatenate(
        [
            np.concatenate([np.ones((F, 1)), C, hat_C], axis=1),
            np.concatenate([np.zeros((2, 3)), np.transpose(C)], axis=1),
            np.concatenate([np.zeros((1, 3)), np.ones((1, F))], axis=1),
        ],
        axis=0,
    )
    # TODO(synk): matrix inverse has no clean Pallas equivalent; it is an
    # input-independent constant (the original module also builds it with
    # numpy), so it stays on the host.
    return np.linalg.inv(delta_C)


def build_P_hat(F, C, P, eps):
    n = P.shape[0]
    P_tile = np.tile(np.expand_dims(P, axis=1), (1, F, 1))
    C_tile = np.expand_dims(C, axis=0)
    P_diff = P_tile - C_tile
    rbf_norm = np.linalg.norm(P_diff, ord=2, axis=2, keepdims=False)
    rbf = np.multiply(np.square(rbf_norm), np.log(rbf_norm + eps))
    return np.concatenate([np.ones((n, 1)), P, rbf], axis=1)


def _build_affine_map(F, I_r_size, fc_weight, fc_bias, eps):
    """Precompose fc + reshape(3,2) + concat + inv_delta_C + P_hat into one
    affine map on the flattened fiducials:

        out_flat[b] = C'_flat[b] @ M_T + c      (out_flat[b, 2p+d] == out[b,p,d])
    """
    C = build_C(F)
    P = build_P(I_r_size)
    inv_delta_C = build_inv_delta_C(F, C)              # (F+3, F+3) f64
    P_hat = build_P_hat(F, C, P, eps)                  # (n, F+3)   f64
    n = P_hat.shape[0]
    Q = P_hat @ inv_delta_C                            # (n, F+3)

    W = np.asarray(fc_weight, np.float64)              # (6, 2F)
    b = np.asarray(fc_bias, np.float64)                # (6,)

    def apply_ref(flats):                              # (K, 2F) -> (K, 2n)
        K = flats.shape[0]
        cp = flats.reshape(K, F, 2)
        ex = (flats @ W.T + b).reshape(K, 3, 2)
        cpz = np.concatenate([cp, ex], axis=1)         # (K, F+3, 2)
        out = np.einsum('nk,bkd->bnd', Q, cpz)         # (K, n, 2)
        return out.reshape(K, 2 * n)

    c = apply_ref(np.zeros((1, 2 * F)))[0]             # (2n,)  affine offset
    M_T = apply_ref(np.eye(2 * F)) - c                 # (2F, 2n) linear part^T
    return M_T, c, n


@functools.lru_cache(maxsize=16)
def _get_affine_const(F, I_r_size, fc_w_bytes, fc_b_bytes):
    """Cached host precompute + single H2D upload of the folded constant matrix.

    Returns (M_pad_device, n) where M_pad has shape (K_pad, N_pad):
      rows 0..2F-1   : linear part (transposed)
      row  2F        : bias row (matched by a ones column appended to flat)
      rows 2F+1..    : zero padding (K padded to a multiple of 128)
      cols 2n..N_pad : zero padding (lane dim padded to a multiple of 128)
    """
    fc_weight = np.frombuffer(fc_w_bytes, dtype=np.float32).reshape(6, 2 * F)
    fc_bias = np.frombuffer(fc_b_bytes, dtype=np.float32)

    M_T, c, n = _build_affine_map(F, I_r_size, fc_weight, fc_bias, EPS)

    K_real = 2 * F + 1                     # 2F inputs + bias column
    K_pad = _round_up(K_real, 128)         # full-lane vld for the activations
    N_pad = _round_up(2 * n, 128)          # unmasked lane-dense stores

    M_pad = np.zeros((K_pad, N_pad), dtype=np.float32)
    M_pad[: 2 * F, : 2 * n] = M_T.astype(np.float32)
    M_pad[2 * F, : 2 * n] = c.astype(np.float32)
    return jnp.asarray(M_pad), n


# ----------------------------------------------------------------------------
# Pallas kernel: one lane-dense matmul per batch tile (bias already folded in).
#   out (TB, N_pad) = flat_aug (TB, K_pad) @ M_pad (K_pad, N_pad)
# ----------------------------------------------------------------------------
def grid_generator_kernel(flat_ref, m_ref, out_ref):
    out_ref[...] = jnp.dot(
        flat_ref[...], m_ref[...], preferred_element_type=jnp.float32
    ).astype(out_ref.dtype)


@functools.partial(jax.jit, static_argnames=("n",))
def _grid_generator_device(batch_C_prime, M_pad, n):
    B, Fnum, _ = batch_C_prime.shape
    K_pad, N_pad = M_pad.shape
    K_real = 2 * Fnum + 1

    flat = batch_C_prime.reshape(B, 2 * Fnum).astype(jnp.float32)
    # Append the ones column (bias fold) and zero-pad K up to K_pad.
    flat_aug = jnp.concatenate([flat, jnp.ones((B, 1), jnp.float32)], axis=1)

    # Batch tiling: TB multiple of 8; shards across TCs on v7x for large B and
    # enables BlockSpec pipelining; tiny batches stay one grid step.
    B8 = _round_up(B, 8)
    TB = B8 if B8 <= 512 else 256
    B_pad = _round_up(B, TB)
    grid_b = B_pad // TB

    flat_p = jnp.pad(flat_aug, ((0, B_pad - B), (0, K_pad - K_real)))

    flops = 2 * B_pad * K_pad * N_pad
    bytes_accessed = 4 * (B_pad * K_pad + K_pad * N_pad + B_pad * N_pad)

    out_flat = pl.pallas_call(
        grid_generator_kernel,
        out_shape=jax.ShapeDtypeStruct((B_pad, N_pad), jnp.float32),
        grid=(grid_b,),
        in_specs=[
            pl.BlockSpec((TB, K_pad), lambda i: (i, 0)),
            pl.BlockSpec((K_pad, N_pad), lambda i: (0, 0)),
        ],
        out_specs=pl.BlockSpec((TB, N_pad), lambda i: (i, 0)),
        compiler_params=pltpu.CompilerParams(
            dimension_semantics=("parallel",)),
        cost_estimate=pl.CostEstimate(
            flops=flops, transcendentals=0, bytes_accessed=bytes_accessed),
    )(flat_p, M_pad)

    # Strip batch/lane padding and de-flatten: out_flat[b, 2p+d] == out[b,p,d].
    return out_flat[:B, : 2 * n].reshape(B, n, 2)


def grid_generator_forward(batch_C_prime, I_r_size, fc_weight, fc_bias,
                           num_fiducial):
    """batch_C_prime: (B, F, 2) f32; fc_weight: (6, 2F); fc_bias: (6,)."""
    F = num_fiducial
    fw = np.asarray(fc_weight, np.float32)
    fb = np.asarray(fc_bias, np.float32)
    M_pad, n = _get_affine_const(F, tuple(int(s) for s in I_r_size),
                                 fw.tobytes(), fb.tobytes())
    return _grid_generator_device(jnp.asarray(batch_C_prime, jnp.float32),
                                  M_pad, n)


# ----------------------------------------------------------------------------
# Plain numpy reference (mirrors the PyTorch forward exactly, same op order)
# ----------------------------------------------------------------------------
def reference_forward(batch_C_prime, I_r_size, fc_weight, fc_bias, num_fiducial):
    F = num_fiducial
    B = batch_C_prime.shape[0]
    C = build_C(F)
    P = build_P(I_r_size)
    inv_delta_C = build_inv_delta_C(F, C).astype(np.float32)
    P_hat = build_P_hat(F, C, P, EPS).astype(np.float32)

    flat = batch_C_prime.reshape(B, -1)                          # (B, 2F)
    ex = (flat @ fc_weight.T + fc_bias).reshape(B, 3, 2)         # (B, 3, 2)
    cpz = np.concatenate([batch_C_prime, ex], axis=1)            # (B, F+3, 2)
    T = np.einsum('ij,bjk->bik', inv_delta_C, cpz)               # (B, F+3, 2)
    return np.einsum('nj,bjk->bnk', P_hat, T)                    # (B, n, 2)


if __name__ == "__main__":
    num_fiducial = 20           # F
    in_channels = 2 * num_fiducial
    B = 2
    I_r_size = (16, 16)         # (H, W) -> n = 256 grid points, 2n = 512 lanes

    key = jax.random.PRNGKey(0)
    k1, k2, k3 = jax.random.split(key, 3)

    # Deterministic synthetic parameters for fc = nn.Linear(in_channels, 6).
    fc_weight = 0.1 * jax.random.normal(k1, (6, in_channels), dtype=jnp.float32)
    fc_bias = 0.1 * jax.random.normal(k2, (6,), dtype=jnp.float32)

    # Fiducial-point predictions in [-1, 1], shape (B, F, 2).
    batch_C_prime = jax.random.uniform(
        k3, (B, num_fiducial, 2), dtype=jnp.float32, minval=-1.0, maxval=1.0)

    out = grid_generator_forward(batch_C_prime, I_r_size, fc_weight, fc_bias,
                                 num_fiducial)
    out = jax.block_until_ready(out)

    # Second call exercises the cached-constant + jitted path.
    out2 = jax.block_until_ready(
        grid_generator_forward(batch_C_prime, I_r_size, fc_weight, fc_bias,
                               num_fiducial))

    ref = reference_forward(np.asarray(batch_C_prime), I_r_size,
                            np.asarray(fc_weight), np.asarray(fc_bias),
                            num_fiducial)

    assert out.shape == (B, I_r_size[0] * I_r_size[1], 2), out.shape
    assert np.all(np.isfinite(np.asarray(out)))
    assert np.allclose(np.asarray(out), ref, rtol=1e-3, atol=1e-3), \
        float(np.max(np.abs(np.asarray(out) - ref)))
    assert np.array_equal(np.asarray(out), np.asarray(out2))

    print("KERNEL_OK")
</pallas_src>

<mosaic_0001>
module attributes {stable_mosaic.version = 11 : i64} {
  func.func @grid_generator_kernel(%arg0: i32, %arg1: memref<8x128xf32, #tpu.memory_space<vmem>>, %arg2: memref<128x512xf32, #tpu.memory_space<vmem>>, %arg3: memref<8x512xf32, #tpu.memory_space<vmem>>) attributes {dimension_semantics = [#tpu.dimension_semantics<parallel>], iteration_bounds = array<i64: 1>, scalar_prefetch = 0 : i64, scratch_operands = 0 : i64, tpu.core_type = #tpu.core_type<tc>, window_params = [{transform_indices = @transform_0, window_bounds = array<i64: 8, 128>}, {pipeline_mode = #tpu.pipeline_mode<synchronous>, transform_indices = @transform_1, window_bounds = array<i64: 128, 512>}, {transform_indices = @transform_2, window_bounds = array<i64: 8, 512>}]} {
    %c0 = arith.constant 0 : index
    %c0_0 = arith.constant 0 : index
    %0 = vector.load %arg1[%c0, %c0_0] : memref<8x128xf32, #tpu.memory_space<vmem>>, vector<8x128xf32>
    %c0_1 = arith.constant 0 : index
    %c0_2 = arith.constant 0 : index
    %1 = vector.load %arg2[%c0_1, %c0_2] : memref<128x512xf32, #tpu.memory_space<vmem>>, vector<128x512xf32>
    %cst = arith.constant dense<0.000000e+00> : vector<8x512xf32>
    %2 = tpu.matmul %0, %1, %cst {dimension_numbers = #tpu.dot_dimension_numbers<[1], [0], [0], [1], [0, 0, 1, 1], [], []>} : vector<8x128xf32>, vector<128x512xf32>, vector<8x512xf32> -> vector<8x512xf32>
    %c0_3 = arith.constant 0 : index
    %c0_4 = arith.constant 0 : index
    %3 = vector.load %arg3[%c0_3, %c0_4] : memref<8x512xf32, #tpu.memory_space<vmem>>, vector<8x512xf32>
    tpu.vector_store %arg3[%c0_3, %c0_4], %2 {strides = array<i32>} : memref<8x512xf32, #tpu.memory_space<vmem>>, vector<8x512xf32>,
    return
  }
  func.func @transform_0(%arg0: i32) -> (i32, i32) {
    %c0_i32 = arith.constant 0 : i32
    %c0_i32_0 = arith.constant 0 : i32
    return %arg0, %c0_i32 : i32, i32
  }
  func.func @transform_1(%arg0: i32) -> (i32, i32) {
    %c0_i32 = arith.constant 0 : i32
    %c0_i32_0 = arith.constant 0 : i32
    %c0_i32_1 = arith.constant 0 : i32
    return %c0_i32, %c0_i32_0 : i32, i32
  }
  func.func @transform_2(%arg0: i32) -> (i32, i32) {
    %c0_i32 = arith.constant 0 : i32
    %c0_i32_0 = arith.constant 0 : i32
    return %arg0, %c0_i32 : i32, i32
  }
}

</mosaic_0001>

<bundles_post_ra>
// kernel: _grid_generator_device.1
= control target key start
LH: loop header
LB: loop body
LE: loop exit
PB: predicated region body
PF: predicated region fallthrough
CT: control target
= control target key end

     0   :  { %7 = vsyncpa [#allocation3], 0  ;;  %s333_s9 = smov [#allocation2]   ;;  %s379_s0 = inlined_call_operand.vmem [shape: f32[8,128], index: 0, kind: input, shape index: {}]   ;;  %s380_s1 = inlined_call_operand.hbm [shape: f32[128,512], index: 1, kind: input, shape index: {}]   ;;  %s381_s2 = inlined_call_operand.vmem [shape: f32[8,512], index: 2, kind: output, shape index: {}]  }
   0x1   :  { %s15_s10 = sshll.u32 %s333_s9, 4  ;;  %s309_s13 = scalar_lea.hbm %s380_s1, 8192  ;;  %s16_s10 = int_to_ptr.vmem [resolvable:$true] %s15_s10 }
   0x2   :  { %p310_p0 = scmp.ne.s32.totalorder %s380_s1, %s309_s13  ;;  %p313_p1 = scmp.lt.u32.totalorder %s309_s13, %s380_s1 }
   0x4   :  { %p315_p2 = pnand %p313_p1, %p310_p0 }
   0x6   :  { %318 = shalt.err (!%p315_p2)
}
   0x7   :  { %s319_s18 = scalar_lea.vmem %s16_s10, 8192  ;;  %p324_p4 = scmp.lt.s32.totalorder %s16_s10, %s16_s10 }
   0x8   :  { %p320_p3 = scmp.ne.s32.totalorder %s16_s10, %s319_s18  ;;  %p325_p5 = scmp.lt.s32.totalorder %s319_s18, %s319_s18 }
   0xa   :  { %p326_p6 = por %p325_p5, %p324_p4 }
   0xc   :  { %p327_p7 = pnand %p326_p6, %p320_p3 }
   0xe   :  { %330 = shalt.err (!%p327_p7)
}
   0xf   :  { %s334_s19 = smov 512   ;;  %s335_s20 = smov 32  }
  0x10   :  { %21 = dma.hbm_to_vmem [thread:$0]  %s380_s1, 8192, %s16_s10, [#allocation3], %s334_s19, %s334_s19, %s335_s20  }
  0x11   :  { %331 = dma.done.wait [#allocation3], 8192  }
  0x12   :  { %332 = vsyncadd [#allocation3], 4294959104  ;;  %v336_v0 = vmov 0.0   ;;  %v27_v1 = vld [vmem:[#allocation2 + $0x8] sm:$0xff]  ;;  %v29_v3 = vld [vmem:[#allocation2 + $0x18] sm:$0xff] }
  0x13   :  { %154 = vmatprep.mubr.f32.mxu0 %v336_v0  ;;  %225 = vmatprep.mubr.f32.mxu1 %v336_v0  ;;  %v31_v2 = vld [vmem:[#allocation2 + $0x28] sm:$0xff]  ;;  %v33_v5 = vld [vmem:[#allocation2 + $0x38] sm:$0xff]  ;;  %v26_v6 = vld [vmem:[#allocation2] sm:$0xff] }
  0x14   :  { %v241_v4 = vpack.c.bf16 %v31_v2, %v27_v1  ;;  %v30_v7 = vld [vmem:[#allocation2 + $0x20] sm:$0xff]  ;;  %v273_v8 = vpack.c.bf16 %v33_v5, %v29_v3  ;;  %v28_v10 = vld [vmem:[#allocation2 + $0x10] sm:$0xff]  ;;  %v35_v12 = vld [vmem:[#allocation2 + $0x48] sm:$0xff] }
  0x15   :  { %v243_v9 = vpack.c.bf16 %v30_v7, %v26_v6  ;;  %v32_v11 = vld [vmem:[#allocation2 + $0x30] sm:$0xff]  ;;  %v39_v14 = vld [vmem:[#allocation2 + $0x68] sm:$0xff]  ;;  %v37_v15 = vld [vmem:[#allocation2 + $0x58] sm:$0xff] }
  0x16   :  { %242 = vmatprep.subr.bf16.mxu0 %v241_v4  ;;  %v275_v13 = vpack.c.bf16 %v32_v11, %v28_v10  ;;  %v41_v16 = vld [vmem:[#allocation2 + $0x78] sm:$0xff]  ;;  %274 = vmatprep.subr.bf16.mxu1 %v273_v8  ;;  %v245_v17 = vpack.c.bf16 %v39_v14, %v35_v12  ;;  %v34_v19 = vld [vmem:[#allocation2 + $0x40] sm:$0xff]  ;;  %v36_v21 = vld [vmem:[#allocation2 + $0x50] sm:$0xff] }
  0x17   :  { %244 = vmatpush1.bf16.msra.mxu0 %v243_v9  ;;  %v277_v18 = vpack.c.bf16 %v41_v16, %v37_v15  ;;  %v38_v20 = vld [vmem:[#allocation2 + $0x60] sm:$0xff]  ;;  %v40_v23 = vld [vmem:[#allocation2 + $0x70] sm:$0xff]  ;;  %v43_v24 = vld [vmem:[#allocation2 + $0x88] sm:$0xff] }
  0x18   :  { %276 = vmatpush1.bf16.msra.mxu1 %v275_v13  ;;  %v247_v22 = vpack.c.bf16 %v38_v20, %v34_v19  ;;  %v47_v25 = vld [vmem:[#allocation2 + $0xa8] sm:$0xff]  ;;  %246 = vmatprep.subr.bf16.mxu0 %v245_v17  ;;  %v279_v26 = vpack.c.bf16 %v40_v23, %v36_v21  ;;  %v45_v28 = vld [vmem:[#allocation2 + $0x98] sm:$0xff]  ;;  %v42_v30 = vld [vmem:[#allocation2 + $0x80] sm:$0xff] }
  0x19   :  { %278 = vmatprep.subr.bf16.mxu1 %v277_v18  ;;  %v249_v27 = vpack.c.bf16 %v47_v25, %v43_v24  ;;  %v49_v29 = vld [vmem:[#allocation2 + $0xb8] sm:$0xff]  ;;  %v46_v32 = vld [vmem:[#allocation2 + $0xa0] sm:$0xff]  ;;  %v44_v33 = vld [vmem:[#allocation2 + $0x90] sm:$0xff] }
  0x1a   :  { %v281_v31 = vpack.c.bf16 %v49_v29, %v45_v28  ;;  %v48_v34 = vld [vmem:[#allocation2 + $0xb0] sm:$0xff]  ;;  %v251_v35 = vpack.c.bf16 %v46_v32, %v42_v30  ;;  %v51_v36 = vld [vmem:[#allocation2 + $0xc8] sm:$0xff]  ;;  %v53_v38 = vld [vmem:[#allocation2 + $0xd8] sm:$0xff] }
  0x1b   :  { %248 = vmatpush1.bf16.msra.mxu0 %v247_v22  ;;  %v55_v37 = vld [vmem:[#allocation2 + $0xe8] sm:$0xff]  ;;  %v283_v39 = vpack.c.bf16 %v48_v34, %v44_v33  ;;  %v57_v41 = vld [vmem:[#allocation2 + $0xf8] sm:$0xff]  ;;  %v50_v42 = vld [vmem:[#allocation2 + $0xc0] sm:$0xff] }
  0x1c   :  { %280 = vmatpush1.bf16.msra.mxu1 %v279_v26  ;;  %250 = vmatprep.subr.bf16.mxu0 %v249_v27  ;;  %v253_v40 = vpack.c.bf16 %v55_v37, %v51_v36  ;;  %v54_v43 = vld [vmem:[#allocation2 + $0xe0] sm:$0xff]  ;;  %v285_v44 = vpack.c.bf16 %v57_v41, %v53_v38  ;;  %v52_v45 = vld [vmem:[#allocation2 + $0xd0] sm:$0xff]  ;;  %v59_v47 = vld [vmem:[#allocation2 + $0x108] sm:$0xff] }
  0x1d   :  { %282 = vmatprep.subr.bf16.mxu1 %v281_v31  ;;  %v56_v46 = vld [vmem:[#allocation2 + $0xf0] sm:$0xff]  ;;  %v63_v48 = vld [vmem:[#allocation2 + $0x128] sm:$0xff]  ;;  %v61_v49 = vld [vmem:[#allocation2 + $0x118] sm:$0xff]  ;;  %v255_v51 = vpack.c.bf16 %v54_v43, %v50_v42 }
  0x1e   :  { %v65_v50 = vld [vmem:[#allocation2 + $0x138] sm:$0xff]  ;;  %v287_v52 = vpack.c.bf16 %v56_v46, %v52_v45  ;;  %v257_v53 = vpack.c.bf16 %v63_v48, %v59_v47  ;;  %v58_v54 = vld [vmem:[#allocation2 + $0x100] sm:$0xff]  ;;  %v60_v56 = vld [vmem:[#allocation2 + $0x110] sm:$0xff] }
  0x1f   :  { %252 = vmatpush1.bf16.msra.mxu0 %v251_v35  ;;  %v62_v55 = vld [vmem:[#allocation2 + $0x120] sm:$0xff]  ;;  %v289_v57 = vpack.c.bf16 %v65_v50, %v61_v49  ;;  %v64_v58 = vld [vmem:[#allocation2 + $0x130] sm:$0xff]  ;;  %v67_v59 = vld [vmem:[#allocation2 + $0x148] sm:$0xff] }
  0x20   :  { %284 = vmatpush1.bf16.msra.mxu1 %v283_v39  ;;  %254 = vmatprep.subr.bf16.mxu0 %v253_v40  ;;  %v71_v60 = vld [vmem:[#allocation2 + $0x168] sm:$0xff]  ;;  %v69_v61 = vld [vmem:[#allocation2 + $0x158] sm:$0xff]  ;;  %v259_v63 = vpack.c.bf16 %v62_v55, %v58_v54  ;;  %v291_v0 = vpack.c.bf16 %v64_v58, %v60_v56  ;;  %v66_v2 = vld [vmem:[#allocation2 + $0x140] sm:$0xff] }
  0x21   :  { %286 = vmatprep.subr.bf16.mxu1 %v285_v44  ;;  %v73_v62 = vld [vmem:[#allocation2 + $0x178] sm:$0xff]  ;;  %v261_v1 = vpack.c.bf16 %v71_v60, %v67_v59  ;;  %v70_v3 = vld [vmem:[#allocation2 + $0x160] sm:$0xff]  ;;  %v68_v4 = vld [vmem:[#allocation2 + $0x150] sm:$0xff] }
  0x22   :  { %v293_v5 = vpack.c.bf16 %v73_v62, %v69_v61  ;;  %v72_v6 = vld [vmem:[#allocation2 + $0x170] sm:$0xff]  ;;  %v75_v7 = vld [vmem:[#allocation2 + $0x188] sm:$0xff]  ;;  %v77_v9 = vld [vmem:[#allocation2 + $0x198] sm:$0xff]  ;;  %v263_v11 = vpack.c.bf16 %v70_v3, %v66_v2 }
  0x23   :  { %256 = vmatpush1.bf16.msra.mxu0 %v255_v51  ;;  %v79_v8 = vld [vmem:[#allocation2 + $0x1a8] sm:$0xff]  ;;  %v81_v10 = vld [vmem:[#allocation2 + $0x1b8] sm:$0xff]  ;;  %v295_v12 = vpack.c.bf16 %v72_v6, %v68_v4  ;;  %v74_v14 = vld [vmem:[#allocation2 + $0x180] sm:$0xff] }
  0x24   :  { %288 = vmatpush1.bf16.msra.mxu1 %v287_v52  ;;  %258 = vmatprep.subr.bf16.mxu0 %v257_v53  ;;  %v265_v13 = vpack.c.bf16 %v79_v8, %v75_v7  ;;  %v78_v15 = vld [vmem:[#allocation2 + $0x1a0] sm:$0xff]  ;;  %v76_v16 = vld [vmem:[#allocation2 + $0x190] sm:$0xff]  ;;  %v297_v17 = vpack.c.bf16 %v81_v10, %v77_v9  ;;  %v83_v19 = vld [vmem:[#allocation2 + $0x1c8] sm:$0xff] }
  0x25   :  { %290 = vmatprep.subr.bf16.mxu1 %v289_v57  ;;  %v80_v18 = vld [vmem:[#allocation2 + $0x1b0] sm:$0xff]  ;;  %v87_v20 = vld [vmem:[#allocation2 + $0x1e8] sm:$0xff]  ;;  %v85_v21 = vld [vmem:[#allocation2 + $0x1d8] sm:$0xff]  ;;  %v267_v23 = vpack.c.bf16 %v78_v15, %v74_v14 }
  0x26   :  { %v89_v22 = vld [vmem:[#allocation2 + $0x1f8] sm:$0xff]  ;;  %v299_v24 = vpack.c.bf16 %v80_v18, %v76_v16  ;;  %v269_v25 = vpack.c.bf16 %v87_v20, %v83_v19  ;;  %v82_v26 = vld [vmem:[#allocation2 + $0x1c0] sm:$0xff]  ;;  %v84_v29 = vld [vmem:[#allocation2 + $0x1d0] sm:$0xff] }
  0x27   :  { %260 = vmatpush1.bf16.msra.mxu0 %v259_v63  ;;  %v86_v27 = vld [vmem:[#allocation2 + $0x1e0] sm:$0xff]  ;;  %v301_v28 = vpack.c.bf16 %v89_v22, %v85_v21  ;;  %v88_v30 = vld [vmem:[#allocation2 + $0x1f0] sm:$0xff] }
  0x28   :  { %292 = vmatpush1.bf16.msra.mxu1 %v291_v0  ;;  %262 = vmatprep.subr.bf16.mxu0 %v261_v1  ;;  %v271_v31 = vpack.c.bf16 %v86_v27, %v82_v26  ;;  %v303_v32 = vpack.c.bf16 %v88_v30, %v84_v29  ;;  %v25_v33 = vld [vmem:[%s379_s0] sm:$0xff] }
  0x29   :  { %294 = vmatprep.subr.bf16.mxu1 %v293_v5 }
  0x2b   :  { %264 = vmatpush1.bf16.msra.mxu0 %v263_v11 }
  0x2c   :  { %296 = vmatpush1.bf16.msra.mxu1 %v295_v12  ;;  %266 = vmatprep.subr.bf16.mxu0 %v265_v13 }
  0x2d   :  { %298 = vmatprep.subr.bf16.mxu1 %v297_v17 }
  0x2f   :  { %268 = vmatpush1.bf16.msra.mxu0 %v267_v23 }
  0x30   :  { %300 = vmatpush1.bf16.msra.mxu1 %v299_v24  ;;  %270 = vmatprep.subr.bf16.mxu0 %v269_v25 }
  0x31   :  { %302 = vmatprep.subr.bf16.mxu1 %v301_v28 }
  0x33   :  { %272 = vmatpush1.bf16.msra.mxu0 %v271_v31 }
  0x34   :  { %304 = vmatpush1.bf16.msra.mxu1 %v303_v32 }
  0x36   :  { %155 = vmatmul.mubr.f32.vlgmr.msra.gmra.mrb[0].mxu0 %v25_v33 }
  0x37   :  { %226 = vmatmul.mubr.f32.vlgmr.msra.gmra.mrb[0].mxu1 %v25_v33 }
 0x109   :  { %v156_v34 = vpop.f32.mrb[0].mxu0 }
 0x10a   :  { %232 = vst [vmem:[%s381_s2] sm:$0xff] %v156_v34  ;;  %v227_v35 = vpop.f32.mrb[0].mxu1  ;;  %v158_v36 = vpop.f32.mrb[1].mxu0 }
 0x10b   :  { %234 = vst [vmem:[%s381_s2 + $0x10] sm:$0xff] %v227_v35  ;;  %233 = vst [vmem:[%s381_s2 + $0x8] sm:$0xff] %v158_v36  ;;  %v229_v37 = vpop.f32.mrb[1].mxu1 }
 0x10c   :  { %235 = vst [vmem:[%s381_s2 + $0x18] sm:$0xff] %v229_v37 }
 0x10d   :  { %240 = vsyncpa [#allocation3], 1 }

</bundles_post_ra>
